<compile_context>
chip_gen: v6e
topology: v6e:2x2x1
jax: 0.10.0
libtpu: 0.0.40
codegen_flags: <defaults>
</compile_context>

<pallas_src>
import functools

import jax
import jax.numpy as jnp
from jax import lax
from jax.experimental import pallas as pl
from jax.experimental.pallas import tpu as pltpu


def _bilateral_loss_kernel(
    x_ref,        # (tH, W)      f32  current input tile   (B squeezed)
    w_ref,        # (C, tH, W)   f32  current weights tile  (channels first)
    out_ref,      # (1, 128)     f32  per-batch resident accumulator
    x_carry_ref,  # (1, W)       f32  last input row of the previous H-tile
    w_carry_ref,  # (C, 1, W)    f32  last weight rows of the previous H-tile
    *, gamma, C, tH, W, inv_n1, inv_n2, inv_n34,
):
    h = pl.program_id(1)
    neg_inv_g = jnp.float32(-1.0 / gamma)

    @pl.when(h == 0)
    def _init():
        out_ref[...] = jnp.zeros_like(out_ref)

    x = x_ref[...].astype(jnp.float32)                        # (tH, W)
    w_ch = [w_ref[c].astype(jnp.float32) for c in range(C)]   # C x (tH, W)

    # np.roll semantics: shift by (size-1) == shift by -1, i.e.
    # shift_w(v)[r, j] = v[r, (j+1) % W],  shift_h(v)[r, j] = v[(r+1) % tH, j].
    def shift_w(v):
        return pltpu.roll(v, shift=v.shape[1] - 1, axis=1)

    def shift_h(v):
        return pltpu.roll(v, shift=tH - 1, axis=0)

    # Validity masks: wrapped columns / rows are excluded; the inter-tile row
    # pair is added separately from the carry.
    col_ok = lax.broadcasted_iota(jnp.int32, (tH, W), 1) < (W - 1)
    row_ok = lax.broadcasted_iota(jnp.int32, (tH, W), 0) < (tH - 1)
    rowcol_ok = jnp.logical_and(row_ok, col_ok)

    def dir_term(xa, xb, wa, wb):
        """exp(-sum_c |wa_c - wb_c| / gamma) * |xa - xb|  (elementwise tile)."""
        dwsum = jnp.abs(wa[0] - wb[0])
        for c in range(1, C):                 # channel reduce = C-1 VPU adds
            dwsum = dwsum + jnp.abs(wa[c] - wb[c])
        return jnp.exp(dwsum * neg_inv_g) * jnp.abs(xa - xb)

    def masked_sum(term, mask):
        if mask is not None:
            term = jnp.where(mask, term, jnp.zeros_like(term))
        return jnp.sum(term, keepdims=True)   # (1, 1)

    # Shifted views (reused across directions).
    x_l = shift_w(x)
    w_l = [shift_w(v) for v in w_ch]
    x_d = shift_h(x)
    w_d = [shift_h(v) for v in w_ch]
    x_dl = shift_w(x_d)
    w_dl = [shift_w(v) for v in w_d]

    # 1) horizontal: (r, j) - (r, j+1)
    s1 = masked_sum(dir_term(x, x_l, w_ch, w_l), col_ok)
    # 2) vertical:   (r, j) - (r+1, j)
    s2 = masked_sum(dir_term(x, x_d, w_ch, w_d), row_ok)
    # 3) diagonal (r,j)-(r+1,j+1) and 4) anti-diagonal (r+1,j)-(r,j+1) share
    #    mask and normalizer -> one select + one reduce for both.
    t34 = dir_term(x, x_dl, w_ch, w_dl) + dir_term(x_d, x_l, w_d, w_l)
    s34 = masked_sum(t34, rowcol_ok)

    out_ref[...] += jnp.float32(0.25) * (
        s1 * jnp.float32(inv_n1)
        + s2 * jnp.float32(inv_n2)
        + s34 * jnp.float32(inv_n34)
    )

    # ---- inter-tile boundary row pair (previous tile's last row vs this
    #      tile's first row).  Only runs when h > 0, so the carry is never
    #      read before it was written (safe under megacore batch sharding)
    #      and the whole block is skipped when a batch fits in one tile. ----
    @pl.when(h > 0)
    def _boundary():
        x_first = x[0:1, :]
        w_first = [v[0:1, :] for v in w_ch]
        xc = x_carry_ref[...]
        wc = [w_carry_ref[c] for c in range(C)]
        col_ok_1 = lax.broadcasted_iota(jnp.int32, (1, W), 1) < (W - 1)

        # vertical pair: full row
        b2 = jnp.sum(dir_term(xc, x_first, wc, w_first), keepdims=True)
        # diagonal + anti-diagonal pairs: share mask & normalizer
        x_first_l = shift_w(x_first)
        w_first_l = [shift_w(v) for v in w_first]
        xc_l = shift_w(xc)
        wc_l = [shift_w(v) for v in wc]
        t34b = (dir_term(xc, x_first_l, wc, w_first_l)
                + dir_term(x_first, xc_l, w_first, wc_l))
        b34 = jnp.sum(jnp.where(col_ok_1, t34b, jnp.zeros_like(t34b)),
                      keepdims=True)

        out_ref[...] += jnp.float32(0.25) * (
            b2 * jnp.float32(inv_n2) + b34 * jnp.float32(inv_n34))

    # Carry this tile's last row for the next (sequential) H-tile.
    x_carry_ref[...] = x[tH - 1:tH, :]
    for c in range(C):
        w_carry_ref[c] = w_ch[c][tH - 1:tH, :]


def _choose_row_block(H, W, C, budget_bytes=2 * 1024 * 1024):
    """Largest H-block that divides H, is a multiple of 8 sublanes (or == H),
    and keeps one (inputs + weights) tile under `budget_bytes`."""
    bytes_per_row = (1 + C) * W * 4
    max_rows = max(1, budget_bytes // bytes_per_row)
    if H <= max_rows:
        return H
    t = (max_rows // 8) * 8
    while t >= 8:
        if H % t == 0:
            return t
        t -= 8
    return H  # fallback: full-H block (a full-extent block is always legal)


def bilateral_loss(inputs, weights, gamma=0.1, *, tile_rows=None):
    """inputs: (B, H, W) f32; weights: (B, H, W, C) f32 -> scalar f32 loss."""
    B, H, W = inputs.shape
    Bw, Hw, Ww, C = weights.shape
    assert (B, H, W) == (Bw, Hw, Ww), "inputs / weights spatial dims must match"
    assert H >= 2 and W >= 2 and C >= 1

    # Channels-first so the tiny C axis is off the 128-lane axis and W is the
    # (lane-dense) last dim of every block.  (One extra pass over weights in
    # HBM; the alternative — C on the lane axis — wastes 125/128 lanes.)
    weights_t = jnp.transpose(weights, (0, 3, 1, 2))   # (B, C, H, W)

    tH = tile_rows if tile_rows is not None else _choose_row_block(H, W, C)
    assert H % tH == 0 and (tH % 8 == 0 or tH == H), "bad H tile size"
    nH = H // tH

    inv_n1 = 1.0 / (B * H * (W - 1))
    inv_n2 = 1.0 / (B * (H - 1) * W)
    inv_n34 = 1.0 / (B * (H - 1) * (W - 1))

    kernel = functools.partial(
        _bilateral_loss_kernel, gamma=float(gamma), C=C, tH=tH, W=W,
        inv_n1=inv_n1, inv_n2=inv_n2, inv_n34=inv_n34)

    out = pl.pallas_call(
        kernel,
        # Lane-dense per-batch partials; summed over B (and identical lanes
        # collapsed) in the wrapper.
        out_shape=jax.ShapeDtypeStruct((B, 1, 128), jnp.float32),
        grid=(B, nH),
        in_specs=[
            pl.BlockSpec((None, tH, W), lambda b, h: (b, h, 0)),
            pl.BlockSpec((None, C, tH, W), lambda b, h: (b, 0, h, 0)),
        ],
        out_specs=pl.BlockSpec((None, 1, 128), lambda b, h: (b, 0, 0)),
        scratch_shapes=[
            pltpu.VMEM((1, W), jnp.float32),      # carried last input row
            pltpu.VMEM((C, 1, W), jnp.float32),   # carried last weight rows
        ],
        compiler_params=pltpu.CompilerParams(
            # Batch axis is parallel (disjoint per-batch output blocks and a
            # halo carry that only crosses H-steps); H axis is a sequential
            # accumulation with a row carry.
            dimension_semantics=("parallel", "arbitrary"),
            vmem_limit_bytes=32 * 1024 * 1024,
        ),
    )(inputs, weights_t)
    return jnp.sum(out[:, 0, 0])


def _reference_bilateral_loss(inputs, weights, gamma=0.1):
    """Pure-JAX reference mirroring the PyTorch module."""
    bf = lambda d: jnp.exp(-jnp.sum(jnp.abs(d), axis=-1) / gamma)
    mean_abs = lambda v: jnp.mean(jnp.abs(v))
    x, w = inputs, weights
    L1 = mean_abs(bf(w[:, :, :-1] - w[:, :, 1:]) * (x[:, :, :-1] - x[:, :, 1:]))
    L2 = mean_abs(bf(w[:, :-1, :] - w[:, 1:, :]) * (x[:, :-1, :] - x[:, 1:, :]))
    L3 = mean_abs(bf(w[:, :-1, :-1] - w[:, 1:, 1:]) * (x[:, :-1, :-1] - x[:, 1:, 1:]))
    L4 = mean_abs(bf(w[:, 1:, :-1] - w[:, :-1, 1:]) * (x[:, 1:, :-1] - x[:, :-1, 1:]))
    return (L1 + L2 + L3 + L4) / 4


if __name__ == "__main__":
    key = jax.random.PRNGKey(0)
    k_inp, k_wgt = jax.random.split(key)
    B, H, W, C = 2, 16, 128, 3
    gamma = 0.1

    inputs = jax.random.normal(k_inp, (B, H, W), dtype=jnp.float32)
    # Scale weights so the bilateral filter is O(1e-2) rather than ~exp(-30):
    # keeps the numerical comparison against the reference meaningful.
    weights = 0.1 * jax.random.normal(k_wgt, (B, H, W, C), dtype=jnp.float32)

    ref = jax.block_until_ready(_reference_bilateral_loss(inputs, weights, gamma))

    # 1) single H-tile per batch element (tH == H): halo path runtime-skipped.
    out1 = jax.block_until_ready(bilateral_loss(inputs, weights, gamma=gamma))
    assert jnp.allclose(out1, ref, rtol=5e-5, atol=1e-7), (out1, ref)

    # 2) forced two H-tiles (tH == 8): exercises the per-batch accumulation
    #    and the row-carry halo path across tile boundaries.
    out2 = jax.block_until_ready(
        bilateral_loss(inputs, weights, gamma=gamma, tile_rows=8))
    assert jnp.allclose(out2, ref, rtol=5e-5, atol=1e-7), (out2, ref)

    print("KERNEL_OK")
</pallas_src>

<mosaic_0001>
module attributes {stable_mosaic.version = 11 : i64} {
  func.func @_bilateral_loss_kernel(%arg0: i32, %arg1: i32, %arg2: memref<1x16x128xf32, #tpu.memory_space<vmem>>, %arg3: memref<1x3x16x128xf32, #tpu.memory_space<vmem>>, %arg4: memref<1x1x128xf32, #tpu.memory_space<vmem>>, %arg5: memref<1x128xf32, #tpu.memory_space<vmem>>, %arg6: memref<3x1x128xf32, #tpu.memory_space<vmem>>) attributes {dimension_semantics = [#tpu.dimension_semantics<parallel>, #tpu.dimension_semantics<arbitrary>], iteration_bounds = array<i64: 2, 1>, scalar_prefetch = 0 : i64, scratch_operands = 2 : i64, tpu.core_type = #tpu.core_type<tc>, window_params = [{transform_indices = @transform_0, window_bounds = array<i64: 1, 16, 128>}, {transform_indices = @transform_1, window_bounds = array<i64: 1, 3, 16, 128>}, {transform_indices = @transform_2, window_bounds = array<i64: 1, 1, 128>}]} {
    %c0_i32 = arith.constant 0 : i32
    %0 = arith.cmpi eq, %arg1, %c0_i32 : i32
    %1 = arith.extui %0 : i1 to i32
    %c0_i32_0 = arith.constant 0 : i32
    %2 = arith.cmpi ne, %1, %c0_i32_0 : i32
    scf.if %2 {
      %cst_58 = arith.constant 0.000000e+00 : f32
      %142 = vector.broadcast %cst_58 : f32 to vector<1x128xf32>
      %c0_59 = arith.constant 0 : index
      %c0_60 = arith.constant 0 : index
      %c0_61 = arith.constant 0 : index
      %143 = vector.load %arg4[%c0_59, %c0_60, %c0_61] : memref<1x1x128xf32, #tpu.memory_space<vmem>>, vector<1x1x128xf32>
      %144 = vector.shape_cast %143 : vector<1x1x128xf32> to vector<1x128xf32>
      %145 = vector.shape_cast %142 : vector<1x128xf32> to vector<1x1x128xf32>
      tpu.vector_store %arg4[%c0_59, %c0_60, %c0_61], %145 {strides = array<i32>} : memref<1x1x128xf32, #tpu.memory_space<vmem>>, vector<1x1x128xf32>,
    } else {
    }
    %c0 = arith.constant 0 : index
    %c0_1 = arith.constant 0 : index
    %c0_2 = arith.constant 0 : index
    %3 = vector.load %arg2[%c0, %c0_1, %c0_2] : memref<1x16x128xf32, #tpu.memory_space<vmem>>, vector<1x16x128xf32>
    %4 = vector.shape_cast %3 : vector<1x16x128xf32> to vector<16x128xf32>
    %c0_3 = arith.constant 0 : index
    %c0_4 = arith.constant 0 : index
    %c0_5 = arith.constant 0 : index
    %c0_6 = arith.constant 0 : index
    %5 = vector.load %arg3[%c0_3, %c0_4, %c0_5, %c0_6] : memref<1x3x16x128xf32, #tpu.memory_space<vmem>>, vector<1x1x16x128xf32>
    %6 = vector.shape_cast %5 : vector<1x1x16x128xf32> to vector<16x128xf32>
    %c0_7 = arith.constant 0 : index
    %c1 = arith.constant 1 : index
    %c0_8 = arith.constant 0 : index
    %c0_9 = arith.constant 0 : index
    %7 = vector.load %arg3[%c0_7, %c1, %c0_8, %c0_9] : memref<1x3x16x128xf32, #tpu.memory_space<vmem>>, vector<1x1x16x128xf32>
    %8 = vector.shape_cast %7 : vector<1x1x16x128xf32> to vector<16x128xf32>
    %c0_10 = arith.constant 0 : index
    %c2 = arith.constant 2 : index
    %c0_11 = arith.constant 0 : index
    %c0_12 = arith.constant 0 : index
    %9 = vector.load %arg3[%c0_10, %c2, %c0_11, %c0_12] : memref<1x3x16x128xf32, #tpu.memory_space<vmem>>, vector<1x1x16x128xf32>
    %10 = vector.shape_cast %9 : vector<1x1x16x128xf32> to vector<16x128xf32>
    %11 = tpu.iota {dimensions = array<i32: 1>} : vector<16x128xi32>
    %c127_i32 = arith.constant 127 : i32
    %12 = vector.broadcast %c127_i32 : i32 to vector<16x128xi32>
    %13 = arith.cmpi slt, %11, %12 : vector<16x128xi32>
    %14 = tpu.iota {dimensions = array<i32: 0>} : vector<16x128xi32>
    %c15_i32 = arith.constant 15 : i32
    %15 = vector.broadcast %c15_i32 : i32 to vector<16x128xi32>
    %16 = arith.cmpi slt, %14, %15 : vector<16x128xi32>
    %17 = arith.andi %16, %13 : vector<16x128xi1>
    %c127_i32_13 = arith.constant 127 : i32
    %18 = tpu.dynamic_rotate %4 by %c127_i32_13 dim 1 : vector<16x128xf32>, i32 -> vector<16x128xf32>
    %c127_i32_14 = arith.constant 127 : i32
    %19 = tpu.dynamic_rotate %6 by %c127_i32_14 dim 1 : vector<16x128xf32>, i32 -> vector<16x128xf32>
    %c127_i32_15 = arith.constant 127 : i32
    %20 = tpu.dynamic_rotate %8 by %c127_i32_15 dim 1 : vector<16x128xf32>, i32 -> vector<16x128xf32>
    %c127_i32_16 = arith.constant 127 : i32
    %21 = tpu.dynamic_rotate %10 by %c127_i32_16 dim 1 : vector<16x128xf32>, i32 -> vector<16x128xf32>
    %c15_i32_17 = arith.constant 15 : i32
    %22 = tpu.dynamic_rotate %4 by %c15_i32_17 dim 0 : vector<16x128xf32>, i32 -> vector<16x128xf32>
    %c15_i32_18 = arith.constant 15 : i32
    %23 = tpu.dynamic_rotate %6 by %c15_i32_18 dim 0 : vector<16x128xf32>, i32 -> vector<16x128xf32>
    %c15_i32_19 = arith.constant 15 : i32
    %24 = tpu.dynamic_rotate %8 by %c15_i32_19 dim 0 : vector<16x128xf32>, i32 -> vector<16x128xf32>
    %c15_i32_20 = arith.constant 15 : i32
    %25 = tpu.dynamic_rotate %10 by %c15_i32_20 dim 0 : vector<16x128xf32>, i32 -> vector<16x128xf32>
    %c127_i32_21 = arith.constant 127 : i32
    %26 = tpu.dynamic_rotate %22 by %c127_i32_21 dim 1 : vector<16x128xf32>, i32 -> vector<16x128xf32>
    %c127_i32_22 = arith.constant 127 : i32
    %27 = tpu.dynamic_rotate %23 by %c127_i32_22 dim 1 : vector<16x128xf32>, i32 -> vector<16x128xf32>
    %c127_i32_23 = arith.constant 127 : i32
    %28 = tpu.dynamic_rotate %24 by %c127_i32_23 dim 1 : vector<16x128xf32>, i32 -> vector<16x128xf32>
    %c127_i32_24 = arith.constant 127 : i32
    %29 = tpu.dynamic_rotate %25 by %c127_i32_24 dim 1 : vector<16x128xf32>, i32 -> vector<16x128xf32>
    %30 = arith.subf %6, %19 : vector<16x128xf32>
    %31 = math.absf %30 : vector<16x128xf32>
    %32 = arith.subf %8, %20 : vector<16x128xf32>
    %33 = math.absf %32 : vector<16x128xf32>
    %34 = arith.addf %31, %33 : vector<16x128xf32>
    %35 = arith.subf %10, %21 : vector<16x128xf32>
    %36 = math.absf %35 : vector<16x128xf32>
    %37 = arith.addf %34, %36 : vector<16x128xf32>
    %cst = arith.constant -1.000000e+01 : f32
    %38 = vector.broadcast %cst : f32 to vector<16x128xf32>
    %39 = arith.mulf %37, %38 : vector<16x128xf32>
    %40 = math.exp %39 : vector<16x128xf32>
    %41 = arith.subf %4, %18 : vector<16x128xf32>
    %42 = math.absf %41 : vector<16x128xf32>
    %43 = arith.mulf %40, %42 : vector<16x128xf32>
    %cst_25 = arith.constant 0.000000e+00 : f32
    %44 = vector.broadcast %cst_25 : f32 to vector<16x128xf32>
    %45 = arith.select %13, %43, %44 : vector<16x128xi1>, vector<16x128xf32>
    %46 = vector.shape_cast %45 : vector<16x128xf32> to vector<1x16x128xf32>
    %cst_26 = arith.constant dense<0.000000e+00> : vector<1xf32>
    %47 = vector.multi_reduction <add>, %46, %cst_26 [1, 2] : vector<1x16x128xf32> to vector<1xf32>
    %48 = vector.shape_cast %47 : vector<1xf32> to vector<1x1x1xf32>
    %49 = vector.extract %48[0, 0, 0] : f32 from vector<1x1x1xf32>
    %50 = vector.broadcast %49 : f32 to vector<1x1xf32>
    %51 = arith.subf %6, %23 : vector<16x128xf32>
    %52 = math.absf %51 : vector<16x128xf32>
    %53 = arith.subf %8, %24 : vector<16x128xf32>
    %54 = math.absf %53 : vector<16x128xf32>
    %55 = arith.addf %52, %54 : vector<16x128xf32>
    %56 = arith.subf %10, %25 : vector<16x128xf32>
    %57 = math.absf %56 : vector<16x128xf32>
    %58 = arith.addf %55, %57 : vector<16x128xf32>
    %cst_27 = arith.constant -1.000000e+01 : f32
    %59 = vector.broadcast %cst_27 : f32 to vector<16x128xf32>
    %60 = arith.mulf %58, %59 : vector<16x128xf32>
    %61 = math.exp %60 : vector<16x128xf32>
    %62 = arith.subf %4, %22 : vector<16x128xf32>
    %63 = math.absf %62 : vector<16x128xf32>
    %64 = arith.mulf %61, %63 : vector<16x128xf32>
    %cst_28 = arith.constant 0.000000e+00 : f32
    %65 = vector.broadcast %cst_28 : f32 to vector<16x128xf32>
    %66 = arith.select %16, %64, %65 : vector<16x128xi1>, vector<16x128xf32>
    %67 = vector.shape_cast %66 : vector<16x128xf32> to vector<1x16x128xf32>
    %cst_29 = arith.constant dense<0.000000e+00> : vector<1xf32>
    %68 = vector.multi_reduction <add>, %67, %cst_29 [1, 2] : vector<1x16x128xf32> to vector<1xf32>
    %69 = vector.shape_cast %68 : vector<1xf32> to vector<1x1x1xf32>
    %70 = vector.extract %69[0, 0, 0] : f32 from vector<1x1x1xf32>
    %71 = vector.broadcast %70 : f32 to vector<1x1xf32>
    %72 = arith.subf %6, %27 : vector<16x128xf32>
    %73 = math.absf %72 : vector<16x128xf32>
    %74 = arith.subf %8, %28 : vector<16x128xf32>
    %75 = math.absf %74 : vector<16x128xf32>
    %76 = arith.addf %73, %75 : vector<16x128xf32>
    %77 = arith.subf %10, %29 : vector<16x128xf32>
    %78 = math.absf %77 : vector<16x128xf32>
    %79 = arith.addf %76, %78 : vector<16x128xf32>
    %cst_30 = arith.constant -1.000000e+01 : f32
    %80 = vector.broadcast %cst_30 : f32 to vector<16x128xf32>
    %81 = arith.mulf %79, %80 : vector<16x128xf32>
    %82 = math.exp %81 : vector<16x128xf32>
    %83 = arith.subf %4, %26 : vector<16x128xf32>
    %84 = math.absf %83 : vector<16x128xf32>
    %85 = arith.mulf %82, %84 : vector<16x128xf32>
    %86 = arith.subf %23, %19 : vector<16x128xf32>
    %87 = math.absf %86 : vector<16x128xf32>
    %88 = arith.subf %24, %20 : vector<16x128xf32>
    %89 = math.absf %88 : vector<16x128xf32>
    %90 = arith.addf %87, %89 : vector<16x128xf32>
    %91 = arith.subf %25, %21 : vector<16x128xf32>
    %92 = math.absf %91 : vector<16x128xf32>
    %93 = arith.addf %90, %92 : vector<16x128xf32>
    %cst_31 = arith.constant -1.000000e+01 : f32
    %94 = vector.broadcast %cst_31 : f32 to vector<16x128xf32>
    %95 = arith.mulf %93, %94 : vector<16x128xf32>
    %96 = math.exp %95 : vector<16x128xf32>
    %97 = arith.subf %22, %18 : vector<16x128xf32>
    %98 = math.absf %97 : vector<16x128xf32>
    %99 = arith.mulf %96, %98 : vector<16x128xf32>
    %100 = arith.addf %85, %99 : vector<16x128xf32>
    %cst_32 = arith.constant 0.000000e+00 : f32
    %101 = vector.broadcast %cst_32 : f32 to vector<16x128xf32>
    %102 = arith.select %17, %100, %101 : vector<16x128xi1>, vector<16x128xf32>
    %103 = vector.shape_cast %102 : vector<16x128xf32> to vector<1x16x128xf32>
    %cst_33 = arith.constant dense<0.000000e+00> : vector<1xf32>
    %104 = vector.multi_reduction <add>, %103, %cst_33 [1, 2] : vector<1x16x128xf32> to vector<1xf32>
    %105 = vector.shape_cast %104 : vector<1xf32> to vector<1x1x1xf32>
    %106 = vector.extract %105[0, 0, 0] : f32 from vector<1x1x1xf32>
    %107 = vector.broadcast %106 : f32 to vector<1x1xf32>
    %c0_34 = arith.constant 0 : index
    %c0_35 = arith.constant 0 : index
    %c0_36 = arith.constant 0 : index
    %108 = vector.load %arg4[%c0_34, %c0_35, %c0_36] : memref<1x1x128xf32, #tpu.memory_space<vmem>>, vector<1x1x128xf32>
    %109 = vector.shape_cast %108 : vector<1x1x128xf32> to vector<1x128xf32>
    %cst_37 = arith.constant 2.460630e-04 : f32
    %110 = vector.broadcast %cst_37 : f32 to vector<1x1xf32>
    %111 = arith.mulf %50, %110 : vector<1x1xf32>
    %cst_38 = arith.constant 2.6041668E-4 : f32
    %112 = vector.broadcast %cst_38 : f32 to vector<1x1xf32>
    %113 = arith.mulf %71, %112 : vector<1x1xf32>
    %114 = arith.addf %111, %113 : vector<1x1xf32>
    %cst_39 = arith.constant 2.62467191E-4 : f32
    %115 = vector.broadcast %cst_39 : f32 to vector<1x1xf32>
    %116 = arith.mulf %107, %115 : vector<1x1xf32>
    %117 = arith.addf %114, %116 : vector<1x1xf32>
    %cst_40 = arith.constant 2.500000e-01 : f32
    %118 = vector.broadcast %cst_40 : f32 to vector<1x1xf32>
    %119 = arith.mulf %118, %117 : vector<1x1xf32>
    %120 = vector.broadcast %119 : vector<1x1xf32> to vector<1x128xf32>
    %121 = arith.addf %109, %120 : vector<1x128xf32>
    %c0_41 = arith.constant 0 : index
    %c0_42 = arith.constant 0 : index
    %c0_43 = arith.constant 0 : index
    %122 = vector.load %arg4[%c0_41, %c0_42, %c0_43] : memref<1x1x128xf32, #tpu.memory_space<vmem>>, vector<1x1x128xf32>
    %123 = vector.shape_cast %122 : vector<1x1x128xf32> to vector<1x128xf32>
    %124 = vector.shape_cast %121 : vector<1x128xf32> to vector<1x1x128xf32>
    tpu.vector_store %arg4[%c0_41, %c0_42, %c0_43], %124 {strides = array<i32>} : memref<1x1x128xf32, #tpu.memory_space<vmem>>, vector<1x1x128xf32>,
    %c0_i32_44 = arith.constant 0 : i32
    %125 = arith.cmpi sgt, %arg1, %c0_i32_44 : i32
    %126 = arith.extui %125 : i1 to i32
    %cst_45 = arith.constant -1.000000e+01 : f32
    %c0_i32_46 = arith.constant 0 : i32
    %127 = arith.cmpi ne, %126, %c0_i32_46 : i32
    scf.if %127 {
      %142 = vector.extract_strided_slice %4 {offsets = [0, 0], sizes = [1, 128], strides = [1, 1]} : vector<16x128xf32> to vector<1x128xf32>
      %143 = vector.extract_strided_slice %6 {offsets = [0, 0], sizes = [1, 128], strides = [1, 1]} : vector<16x128xf32> to vector<1x128xf32>
      %144 = vector.extract_strided_slice %8 {offsets = [0, 0], sizes = [1, 128], strides = [1, 1]} : vector<16x128xf32> to vector<1x128xf32>
      %145 = vector.extract_strided_slice %10 {offsets = [0, 0], sizes = [1, 128], strides = [1, 1]} : vector<16x128xf32> to vector<1x128xf32>
      %c0_58 = arith.constant 0 : index
      %c0_59 = arith.constant 0 : index
      %146 = vector.load %arg5[%c0_58, %c0_59] : memref<1x128xf32, #tpu.memory_space<vmem>>, vector<1x128xf32>
      %c0_60 = arith.constant 0 : index
      %c0_61 = arith.constant 0 : index
      %c0_62 = arith.constant 0 : index
      %147 = vector.load %arg6[%c0_60, %c0_61, %c0_62] : memref<3x1x128xf32, #tpu.memory_space<vmem>>, vector<1x1x128xf32>
      %148 = vector.shape_cast %147 : vector<1x1x128xf32> to vector<1x128xf32>
      %c1_63 = arith.constant 1 : index
      %c0_64 = arith.constant 0 : index
      %c0_65 = arith.constant 0 : index
      %149 = vector.load %arg6[%c1_63, %c0_64, %c0_65] : memref<3x1x128xf32, #tpu.memory_space<vmem>>, vector<1x1x128xf32>
      %150 = vector.shape_cast %149 : vector<1x1x128xf32> to vector<1x128xf32>
      %c2_66 = arith.constant 2 : index
      %c0_67 = arith.constant 0 : index
      %c0_68 = arith.constant 0 : index
      %151 = vector.load %arg6[%c2_66, %c0_67, %c0_68] : memref<3x1x128xf32, #tpu.memory_space<vmem>>, vector<1x1x128xf32>
      %152 = vector.shape_cast %151 : vector<1x1x128xf32> to vector<1x128xf32>
      %153 = tpu.iota {dimensions = array<i32: 1>} : vector<1x128xi32>
      %c127_i32_69 = arith.constant 127 : i32
      %154 = vector.broadcast %c127_i32_69 : i32 to vector<1x128xi32>
      %155 = arith.cmpi slt, %153, %154 : vector<1x128xi32>
      %156 = arith.subf %148, %143 : vector<1x128xf32>
      %157 = math.absf %156 : vector<1x128xf32>
      %158 = arith.subf %150, %144 : vector<1x128xf32>
      %159 = math.absf %158 : vector<1x128xf32>
      %160 = arith.addf %157, %159 : vector<1x128xf32>
      %161 = arith.subf %152, %145 : vector<1x128xf32>
      %162 = math.absf %161 : vector<1x128xf32>
      %163 = arith.addf %160, %162 : vector<1x128xf32>
      %164 = vector.broadcast %cst_45 : f32 to vector<1x128xf32>
      %165 = arith.mulf %163, %164 : vector<1x128xf32>
      %166 = math.exp %165 : vector<1x128xf32>
      %167 = arith.subf %146, %142 : vector<1x128xf32>
      %168 = math.absf %167 : vector<1x128xf32>
      %169 = arith.mulf %166, %168 : vector<1x128xf32>
      %170 = vector.shape_cast %169 : vector<1x128xf32> to vector<1x1x128xf32>
      %cst_70 = arith.constant dense<0.000000e+00> : vector<1xf32>
      %171 = vector.multi_reduction <add>, %170, %cst_70 [1, 2] : vector<1x1x128xf32> to vector<1xf32>
      %172 = vector.shape_cast %171 : vector<1xf32> to vector<1x1x1xf32>
      %173 = vector.extract %172[0, 0, 0] : f32 from vector<1x1x1xf32>
      %174 = vector.broadcast %173 : f32 to vector<1x1xf32>
      %c127_i32_71 = arith.constant 127 : i32
      %175 = tpu.dynamic_rotate %142 by %c127_i32_71 dim 1 : vector<1x128xf32>, i32 -> vector<1x128xf32>
      %c127_i32_72 = arith.constant 127 : i32
      %176 = tpu.dynamic_rotate %143 by %c127_i32_72 dim 1 : vector<1x128xf32>, i32 -> vector<1x128xf32>
      %c127_i32_73 = arith.constant 127 : i32
      %177 = tpu.dynamic_rotate %144 by %c127_i32_73 dim 1 : vector<1x128xf32>, i32 -> vector<1x128xf32>
      %c127_i32_74 = arith.constant 127 : i32
      %178 = tpu.dynamic_rotate %145 by %c127_i32_74 dim 1 : vector<1x128xf32>, i32 -> vector<1x128xf32>
      %c127_i32_75 = arith.constant 127 : i32
      %179 = tpu.dynamic_rotate %146 by %c127_i32_75 dim 1 : vector<1x128xf32>, i32 -> vector<1x128xf32>
      %c127_i32_76 = arith.constant 127 : i32
      %180 = tpu.dynamic_rotate %148 by %c127_i32_76 dim 1 : vector<1x128xf32>, i32 -> vector<1x128xf32>
      %c127_i32_77 = arith.constant 127 : i32
      %181 = tpu.dynamic_rotate %150 by %c127_i32_77 dim 1 : vector<1x128xf32>, i32 -> vector<1x128xf32>
      %c127_i32_78 = arith.constant 127 : i32
      %182 = tpu.dynamic_rotate %152 by %c127_i32_78 dim 1 : vector<1x128xf32>, i32 -> vector<1x128xf32>
      %183 = arith.subf %148, %176 : vector<1x128xf32>
      %184 = math.absf %183 : vector<1x128xf32>
      %185 = arith.subf %150, %177 : vector<1x128xf32>
      %186 = math.absf %185 : vector<1x128xf32>
      %187 = arith.addf %184, %186 : vector<1x128xf32>
      %188 = arith.subf %152, %178 : vector<1x128xf32>
      %189 = math.absf %188 : vector<1x128xf32>
      %190 = arith.addf %187, %189 : vector<1x128xf32>
      %191 = vector.broadcast %cst_45 : f32 to vector<1x128xf32>
      %192 = arith.mulf %190, %191 : vector<1x128xf32>
      %193 = math.exp %192 : vector<1x128xf32>
      %194 = arith.subf %146, %175 : vector<1x128xf32>
      %195 = math.absf %194 : vector<1x128xf32>
      %196 = arith.mulf %193, %195 : vector<1x128xf32>
      %197 = arith.subf %143, %180 : vector<1x128xf32>
      %198 = math.absf %197 : vector<1x128xf32>
      %199 = arith.subf %144, %181 : vector<1x128xf32>
      %200 = math.absf %199 : vector<1x128xf32>
      %201 = arith.addf %198, %200 : vector<1x128xf32>
      %202 = arith.subf %145, %182 : vector<1x128xf32>
      %203 = math.absf %202 : vector<1x128xf32>
      %204 = arith.addf %201, %203 : vector<1x128xf32>
      %205 = vector.broadcast %cst_45 : f32 to vector<1x128xf32>
      %206 = arith.mulf %204, %205 : vector<1x128xf32>
      %207 = math.exp %206 : vector<1x128xf32>
      %208 = arith.subf %142, %179 : vector<1x128xf32>
      %209 = math.absf %208 : vector<1x128xf32>
      %210 = arith.mulf %207, %209 : vector<1x128xf32>
      %211 = arith.addf %196, %210 : vector<1x128xf32>
      %cst_79 = arith.constant 0.000000e+00 : f32
      %212 = vector.broadcast %cst_79 : f32 to vector<1x128xf32>
      %213 = arith.select %155, %211, %212 : vector<1x128xi1>, vector<1x128xf32>
      %214 = vector.shape_cast %213 : vector<1x128xf32> to vector<1x1x128xf32>
      %cst_80 = arith.constant dense<0.000000e+00> : vector<1xf32>
      %215 = vector.multi_reduction <add>, %214, %cst_80 [1, 2] : vector<1x1x128xf32> to vector<1xf32>
      %216 = vector.shape_cast %215 : vector<1xf32> to vector<1x1x1xf32>
      %217 = vector.extract %216[0, 0, 0] : f32 from vector<1x1x1xf32>
      %218 = vector.broadcast %217 : f32 to vector<1x1xf32>
      %c0_81 = arith.constant 0 : index
      %c0_82 = arith.constant 0 : index
      %c0_83 = arith.constant 0 : index
      %219 = vector.load %arg4[%c0_81, %c0_82, %c0_83] : memref<1x1x128xf32, #tpu.memory_space<vmem>>, vector<1x1x128xf32>
      %220 = vector.shape_cast %219 : vector<1x1x128xf32> to vector<1x128xf32>
      %cst_84 = arith.constant 2.6041668E-4 : f32
      %221 = vector.broadcast %cst_84 : f32 to vector<1x1xf32>
      %222 = arith.mulf %174, %221 : vector<1x1xf32>
      %cst_85 = arith.constant 2.62467191E-4 : f32
      %223 = vector.broadcast %cst_85 : f32 to vector<1x1xf32>
      %224 = arith.mulf %218, %223 : vector<1x1xf32>
      %225 = arith.addf %222, %224 : vector<1x1xf32>
      %cst_86 = arith.constant 2.500000e-01 : f32
      %226 = vector.broadcast %cst_86 : f32 to vector<1x1xf32>
      %227 = arith.mulf %226, %225 : vector<1x1xf32>
      %228 = vector.broadcast %227 : vector<1x1xf32> to vector<1x128xf32>
      %229 = arith.addf %220, %228 : vector<1x128xf32>
      %c0_87 = arith.constant 0 : index
      %c0_88 = arith.constant 0 : index
      %c0_89 = arith.constant 0 : index
      %230 = vector.load %arg4[%c0_87, %c0_88, %c0_89] : memref<1x1x128xf32, #tpu.memory_space<vmem>>, vector<1x1x128xf32>
      %231 = vector.shape_cast %230 : vector<1x1x128xf32> to vector<1x128xf32>
      %232 = vector.shape_cast %229 : vector<1x128xf32> to vector<1x1x128xf32>
      tpu.vector_store %arg4[%c0_87, %c0_88, %c0_89], %232 {strides = array<i32>} : memref<1x1x128xf32, #tpu.memory_space<vmem>>, vector<1x1x128xf32>,
    } else {
    }
    %128 = vector.extract_strided_slice %4 {offsets = [15, 0], sizes = [1, 128], strides = [1, 1]} : vector<16x128xf32> to vector<1x128xf32>
    %c0_47 = arith.constant 0 : index
    %c0_48 = arith.constant 0 : index
    %129 = vector.load %arg5[%c0_47, %c0_48] : memref<1x128xf32, #tpu.memory_space<vmem>>, vector<1x128xf32>
    tpu.vector_store %arg5[%c0_47, %c0_48], %128 {strides = array<i32>} : memref<1x128xf32, #tpu.memory_space<vmem>>, vector<1x128xf32>,
    %130 = vector.extract_strided_slice %6 {offsets = [15, 0], sizes = [1, 128], strides = [1, 1]} : vector<16x128xf32> to vector<1x128xf32>
    %c0_49 = arith.constant 0 : index
    %c0_50 = arith.constant 0 : index
    %c0_51 = arith.constant 0 : index
    %131 = vector.load %arg6[%c0_49, %c0_50, %c0_51] : memref<3x1x128xf32, #tpu.memory_space<vmem>>, vector<1x1x128xf32>
    %132 = vector.shape_cast %131 : vector<1x1x128xf32> to vector<1x128xf32>
    %133 = vector.shape_cast %130 : vector<1x128xf32> to vector<1x1x128xf32>
    tpu.vector_store %arg6[%c0_49, %c0_50, %c0_51], %133 {strides = array<i32>} : memref<3x1x128xf32, #tpu.memory_space<vmem>>, vector<1x1x128xf32>,
    %134 = vector.extract_strided_slice %8 {offsets = [15, 0], sizes = [1, 128], strides = [1, 1]} : vector<16x128xf32> to vector<1x128xf32>
    %c1_52 = arith.constant 1 : index
    %c0_53 = arith.constant 0 : index
    %c0_54 = arith.constant 0 : index
    %135 = vector.load %arg6[%c1_52, %c0_53, %c0_54] : memref<3x1x128xf32, #tpu.memory_space<vmem>>, vector<1x1x128xf32>
    %136 = vector.shape_cast %135 : vector<1x1x128xf32> to vector<1x128xf32>
    %137 = vector.shape_cast %134 : vector<1x128xf32> to vector<1x1x128xf32>
    tpu.vector_store %arg6[%c1_52, %c0_53, %c0_54], %137 {strides = array<i32>} : memref<3x1x128xf32, #tpu.memory_space<vmem>>, vector<1x1x128xf32>,
    %138 = vector.extract_strided_slice %10 {offsets = [15, 0], sizes = [1, 128], strides = [1, 1]} : vector<16x128xf32> to vector<1x128xf32>
    %c2_55 = arith.constant 2 : index
    %c0_56 = arith.constant 0 : index
    %c0_57 = arith.constant 0 : index
    %139 = vector.load %arg6[%c2_55, %c0_56, %c0_57] : memref<3x1x128xf32, #tpu.memory_space<vmem>>, vector<1x1x128xf32>
    %140 = vector.shape_cast %139 : vector<1x1x128xf32> to vector<1x128xf32>
    %141 = vector.shape_cast %138 : vector<1x128xf32> to vector<1x1x128xf32>
    tpu.vector_store %arg6[%c2_55, %c0_56, %c0_57], %141 {strides = array<i32>} : memref<3x1x128xf32, #tpu.memory_space<vmem>>, vector<1x1x128xf32>,
    return
  }
  func.func @transform_0(%arg0: i32, %arg1: i32) -> (i32, i32, i32) {
    %c0_i32 = arith.constant 0 : i32
    %c0_i32_0 = arith.constant 0 : i32
    return %arg0, %arg1, %c0_i32 : i32, i32, i32
  }
  func.func @transform_1(%arg0: i32, %arg1: i32) -> (i32, i32, i32, i32) {
    %c0_i32 = arith.constant 0 : i32
    %c0_i32_0 = arith.constant 0 : i32
    %c0_i32_1 = arith.constant 0 : i32
    return %arg0, %c0_i32, %arg1, %c0_i32_0 : i32, i32, i32, i32
  }
  func.func @transform_2(%arg0: i32, %arg1: i32) -> (i32, i32, i32) {
    %c0_i32 = arith.constant 0 : i32
    %c0_i32_0 = arith.constant 0 : i32
    %c0_i32_1 = arith.constant 0 : i32
    return %arg0, %c0_i32, %c0_i32_0 : i32, i32, i32
  }
}

</mosaic_0001>

<bundles_post_ra>
// kernel: tpu_custom_call.1
= control target key start
LH: loop header
LB: loop body
LE: loop exit
PB: predicated region body
PF: predicated region fallthrough
CT: control target
= control target key end

     0   :  { %7 = vsyncpa [#allocation5], 0  ;;  %s1261_s0 = inlined_call_operand.hbm [shape: f32[2,16,128], index: 0, kind: input, shape index: {}]   ;;  %s1262_s1 = inlined_call_operand.hbm [shape: f32[2,3,16,128], index: 1, kind: input, shape index: {}]   ;;  %s1263_s2 = inlined_call_operand.hbm [shape: f32[2,1,128], index: 2, kind: output, shape index: {}]  }
   0x1   :  { %9 = vsyncpa [#allocation5 + $0x1], 0 }
   0x2   :  { %10 = vsyncpa [#allocation8], 0 }
   0x3   :  { %12 = vsyncpa [#allocation8 + $0x1], 0 }
   0x4   :  { %13 = vsyncpa [#allocation6], 0 }
   0x5   :  { %15 = vsyncpa [#allocation6 + $0x1], 0  ;;  %s951_s9 = smov 0   ;;  %s953_s10 = smov 0  }
   0x6   :  { %s955_s11 = smov 0   ;;  %s957_s12 = smov 0  }
   0x7   :  { %s959_s13 = smov 0   ;;  %s961_s14 = smov 0  }
   0x8 LB: > { %s673_s15 = sadd.s32 4294967295, %s927_s14   ;;  %s674_s16 = sadd.s32 4294967294, %s927_s14   ;;  %s927_s14 = sphi %s961_s14, %s21_s14   ;;  %s923_s13 = sphi %s959_s13, %s1277_s13   ;;  %s919_s12 = sphi %s957_s12, %s1276_s12   ;;  %s915_s11 = sphi %s955_s11, %s1275_s11   ;;  %s911_s10 = sphi %s953_s10, %s1274_s10   ;;  %s907_s9 = sphi %s951_s9, %s1273_s9  }
   0x9   : > { %s33_s17 = sadd.s32 1, %s923_s13  ;;  %s42_s18 = sadd.s32 1, %s915_s11 }
   0xa   : > { %p35_p0 = scmp.ge.s32.totalorder %s33_s17, 2  ;;  %p49_p1 = scmp.ne.s32.totalorder %s915_s11, %s911_s10 }
   0xb   : > { %p50_p2 = scmp.eq.s32.totalorder %s927_s14, 0  ;;  %p55_p3 = scmp.ne.s32.totalorder %s911_s10, %s907_s9 }
   0xc   : > { %s1279_s17 = smov (%p35_p0, %s33_s17), 0  ;;  %p56_p5 = scmp.eq.s32.totalorder %s673_s15, 0 }
   0xd   : > { %p992_p4 = por %p50_p2, %p49_p1  ;;  %s37_s20 = ssub.s32 %s923_s13, %s1279_s17 }
   0xe   : > { %p107_p6 = scmp.eq.s32.totalorder %s673_s15, 1  ;;  %p40_p7 = scmp.eq.s32.totalorder %s37_s20, 0 }
   0xf   : > { %p998_p8 = por %p56_p5, %p55_p3  ;;  %p113_p10 = scmp.eq.s32.totalorder %s674_s16, 1 }
  0x10   : > { %p1002_p9 = por %p107_p6, %p49_p1  ;;  %p717_p13 = scmp.lt.s32.totalorder %s927_s14, 2 }
  0x11   : > { %s1007_s23 = scalar_select %p40_p7, %s915_s11, %s42_s18  }
  0x12   : > { %p1009_p11 = por %p113_p10, %p55_p3  ;;  %s1016_s25 = sand.u32 1, %s915_s11  }
  0x13   : > { %s677_s26 = sshll.u32 %s1016_s25, 4  ;;  %s690_s27 = sshll.u32 %s923_s13, 8 }
  0x14   : > { %s145_s30 = scalar_lea.hbm %s1261_s0, %s690_s27  ;;  %s137_s3 = scalar_lea.vmem [#allocation4], %s677_s26 }
  0x15   : > { %s146_s4 = sshll.u32 %s137_s3, 4  ;;  %p1025_p0 = pnand %p717_p13, %p992_p4  ;;  %s147_s4 = int_to_ptr.vmem [resolvable:$true] %s146_s4 }
  0x16   : > { %p681_p1 = scmp.ge.s32.totalorder %s927_s14, 1  ;;  %s134_s6 = scalar_lea.sflag [#allocation5], %s1016_s25 }
  0x17   : > { %p789_p2 = pneg %p1025_p0  ;;  %s800_s7 = scalar_lea.vmem %s147_s4, 256 }
  0x18   : > { %p801_p3 = scmp.ne.s32.totalorder %s147_s4, %s800_s7  ;;  %s929_s8 = smov [#allocation4]  }
  0x19   : > { %s805_s15 = sshll.u32 %s929_s8, 4  ;;  %s806_s15 = int_to_ptr.vmem [resolvable:$false] %s805_s15 }
  0x1a   : > { %p803_p5 = pnand %p801_p3, %p789_p2  ;;  %s807_s16 = scalar_lea.vmem %s806_s15, 512 }
  0x1b   : > { %p808_p4 = scmp.lt.s32.totalorder %s147_s4, %s806_s15  ;;  %p809_p7 = scmp.lt.s32.totalorder %s807_s16, %s800_s7 }
  0x1c   : > { %p804_p6 = pneg %p803_p5 }
  0x1d   : > { %p810_p10 = por %p809_p7, %p808_p4 }
  0x1f   : > { %p811_p13 = pnand %p810_p10, %p804_p6 }
  0x21   : > { %814 = shalt.err (!%p811_p13)
}
  0x22   : > { %s930_s18 = smov 128   ;;  %s931_s19 = smov 8  }
  0x23   : > { %709 = dma.hbm_to_vmem [thread:$0]  (!%p1025_p0), %s145_s30, 256, %s147_s4, %s134_s6, %s930_s18, %s930_s18, %s931_s19  }
  0x24   : > { %p177_p3 = scmp.lt.s32.totalorder %s927_s14, 3  ;;  %s691_s20 = smul.u32 48, %s1016_s25 }
  0x25   : > { %s692_s27 = smul.u32 768, %s923_s13  ;;  %s157_s15 = scalar_lea.sflag [#allocation8], %s1016_s25 }
  0x26   : > { %p1042_p5 = pnand %p681_p1, %p177_p3  ;;  %s160_s7 = scalar_lea.vmem [#allocation7], %s691_s20 }
  0x27   : > { %s168_s3 = scalar_lea.hbm %s1262_s1, %s692_s27  ;;  %s169_s8 = sshll.u32 %s160_s7, 4  ;;  %s170_s8 = int_to_ptr.vmem [resolvable:$true] %s169_s8 }
  0x28   : > { %s828_s16 = scalar_lea.vmem %s170_s8, 768  ;;  %s932_s30 = smov [#allocation7]  }
  0x29   : > { %p829_p6 = scmp.ne.s32.totalorder %s170_s8, %s828_s16  ;;  %s833_s4 = sshll.u32 %s932_s30, 4  ;;  %s834_s4 = int_to_ptr.vmem [resolvable:$false] %s833_s4 }
  0x2a   : > { %s835_s6 = scalar_lea.vmem %s834_s4, 1536  ;;  %p836_p1 = scmp.lt.s32.totalorder %s170_s8, %s834_s4 }
  0x2b   : > { %p831_p4 = pnand %p829_p6, %p789_p2  ;;  %p837_p10 = scmp.lt.s32.totalorder %s835_s6, %s828_s16 }
  0x2d   : > { %p832_p7 = pneg %p831_p4  ;;  %p838_p13 = por %p837_p10, %p836_p1 }
  0x2f   : > { %p839_p3 = pnand %p838_p13, %p832_p7 }
  0x31   : > { %842 = shalt.err (!%p839_p3)
}
  0x32   : > { %712 = dma.hbm_to_vmem [thread:$0]  (!%p1025_p0), %s168_s3, 768, %s170_s8, %s157_s15, %s930_s18, %s930_s18, %s931_s19  }
  0x33   : > { %181 = sbr.rel (%p1042_p5) target bundleno = 451 (0x1c3), region = 28  ;;  %s1059_s25 = sand.u32 (!%p1042_p5), 1, %s911_s10  }
  0x34   : > { %s682_s20 = sshll.u32 (!%p1042_p5), %s1059_s25, 4  ;;  %s184_s27 = scalar_lea.sflag (!%p1042_p5), [#allocation5], %s1059_s25 }
  0x35   : > { %s1063_s28 = scalar_lea.vmem (!%p1042_p5), [#allocation4], %s682_s20 }
  0x38   : > { %894 = dma.done.wait (%p998_p8), %s184_s27, 256  }
  0x39   : > { %896 = vsyncadd (%p998_p8), %s184_s27, 4294967040  ;;  %s693_s5 = smul.u32 48, %s1059_s25  ;;  %s193_s18 = scalar_lea.sflag [#allocation8], %s1059_s25 }
  0x3b   : > { %s196_s19 = scalar_lea.vmem [#allocation7], %s693_s5 }
  0x3c   : > { %898 = dma.done.wait (%p998_p8), %s193_s18, 768  }
  0x3d   : > { %900 = vsyncadd (%p998_p8), %s193_s18, 4294966528  ;;  %v238_v0 = vlaneseq  ;;  %v1075_v2 = vld [vmem:[%s196_s19 + $0x10] sm:$0xff]  ;;  %v1077_v3 = vld [vmem:[%s196_s19] sm:$0xff]  ;;  %s933_s26 = smov 127   ;;  %s1215_s21 = scalar_lea.vmem [#allocation9], %s1059_s25 }
  0x3e   : > { %v1079_v4 = vld [vmem:[%s196_s19 + $0x18] sm:$0xff]  ;;  %256 = vrot.lane.b32.xlu1 %v1075_v2, %s933_s26  ;;  %252 = vrot.lane.b32.xlu0 %v1077_v3, %s933_s26  ;;  %v1085_v5 = vld [vmem:[%s196_s19 + $0x8] sm:$0xff]  ;;  %v269_v7 = vrot.slane %v1077_v3, 1  ;;  %v273_v12 = vrot.slane %v1075_v2, 1  ;;  %s687_s8 = sshll.u32 %s919_s12, 4  ;;  %s570_s15 = sshll.u32 %s1215_s21, 4  ;;  %s571_s15 = int_to_ptr.vmem [resolvable:$true] %s570_s15 }
  0x3f   : > { %v242_v1 = vshrl.u32 %v238_v0, 7  ;;  %v1087_v6 = vld [vmem:[%s196_s19 + $0x28] sm:$0xff]  ;;  %v270_v8 = vrot.slane %v1085_v5, 1  ;;  %v274_v13 = vrot.slane %v1079_v4, 1  ;;  %v1116_v16 = vld [vmem:[%s196_s19 + $0x20] sm:$0xff]  ;;  %v1169_v44 = vand.u32 127, %v238_v0  ;;  %s568_s4 = scalar_lea.hbm %s1263_s2, %s687_s8 }
  0x40   : > { %v1092_v9 = vld [vmem:[%s1063_s28 + $0x8] sm:$0xff]  ;;  %v277_v17 = vrot.slane %v1116_v16, 1  ;;  %v278_v18 = vrot.slane %v1087_v6, 1  ;;  %v1145_v28 = vld [vmem:[%s1063_s28] sm:$0xff]  ;;  %s558_s6 = scalar_lea.sflag [#allocation6], %s1059_s25  ;;  %s843_s20 = scalar_lea.vmem %s571_s15, 16 }
  0x41   : > { %vm266_vm0 = vcmp.lt.s32.totalorder %v242_v1, 7  ;;  %v264_v34 = vrot.slane %v1145_v28, 1  ;;  %v265_v35 = vrot.slane %v1092_v9, 1  ;;  %v243_v43 = vadd.s32 8, %v242_v1  ;;  %p844_p8 = scmp.ne.s32.totalorder %s571_s15, %s843_s20  ;;  %s935_s27 = smov [#allocation9]  }
  0x42   : > { %258 = vrot.lane.b32.xlu1 %v1079_v4, %s933_s26  ;;  %254 = vrot.lane.b32.xlu0 %v1085_v5, %s933_s26  ;;  %v1099_v10 = vsel %vm266_vm0, %v270_v8, %v269_v7  ;;  %v1102_v11 = vsel %vm266_vm0, %v269_v7, %v270_v8  ;;  %v1111_v14 = vsel %vm266_vm0, %v274_v13, %v273_v12  ;;  %vm240_vm2 = vcmp.lt.s32.totalorder %v1169_v44, 127  ;;  %s847_s28 = sshll.u32 %s935_s27, 4  ;;  %s848_s28 = int_to_ptr.vmem [resolvable:$false] %s847_s28 }
  0x43   : > { %v1114_v15 = vsel %vm266_vm0, %v273_v12, %v274_v13  ;;  %v339_v19 = vsub.f32 %v1085_v5, %v1099_v10  ;;  %v343_v20 = vsub.f32 %v1079_v4, %v1111_v14  ;;  %v338_v21 = vsub.f32 %v1077_v3, %v1102_v11  ;;  %p845_p0 = pnand %p844_p8, %p1002_p9  ;;  %s849_s5 = scalar_lea.vmem %s848_s28, 32 }
  0x44   : > { %v342_v22 = vsub.f32 %v1075_v2, %v1114_v15  ;;  %v1137_v23 = vsel %vm266_vm0, %v278_v18, %v277_v17  ;;  %v1142_v27 = vsel %vm266_vm0, %v277_v17, %v278_v18  ;;  %v1160_v39 = vsel %vm266_vm0, %v265_v35, %v264_v34  ;;  %p850_p5 = scmp.lt.s32.totalorder %s571_s15, %s848_s28  ;;  %p851_p6 = scmp.lt.s32.totalorder %s849_s5, %s843_s20 }
  0x45   : > { %v341_v24 = vand.u32 2147483647, %v339_v19  ;;  %v345_v25 = vand.u32 2147483647, %v343_v20  ;;  %v349_v26 = vsub.f32 %v1087_v6, %v1137_v23  ;;  %v340_v29 = vand.u32 2147483647, %v338_v21  ;;  %p846_p2 = pneg %p845_p0 }
  0x46   : > { %287 = vrot.lane.b32.xlu1 %v1099_v10, %s933_s26  ;;  %285 = vrot.lane.b32.xlu0 %v1102_v11, %s933_s26  ;;  %v344_v30 = vand.u32 2147483647, %v342_v22  ;;  %v348_v31 = vsub.f32 %v1116_v16, %v1142_v27  ;;  %v1163_v40 = vsel %vm266_vm0, %v264_v34, %v265_v35  ;;  %vm245_vm1 = vcmp.lt.s32.totalorder %v243_v43, 15  ;;  %p852_p4 = por %p851_p6, %p850_p5 }
  0x47   : > { %v347_v32 = vadd.f32 %v345_v25, %v341_v24  ;;  %v351_v33 = vand.u32 2147483647, %v349_v26  ;;  %vm1174_vm3 = vmand %vm245_vm1, %vm240_vm2  ;;  %v361_v49 = vsub.f32 %v1092_v9, %v1160_v39  ;;  %v360_v50 = vsub.f32 %v1145_v28, %v1163_v40 }
  0x48   : > { %v346_v36 = vadd.f32 %v344_v30, %v340_v29  ;;  %v350_v37 = vand.u32 2147483647, %v348_v31  ;;  %p853_p7 = pnand %p852_p4, %p846_p2 }
  0x49   : > { %v353_v38 = vadd.f32 %v351_v33, %v347_v32  ;;  %v363_v51 = vand.u32 2147483647, %v361_v49  ;;  %v362_v53 = vand.u32 2147483647, %v360_v50 }
  0x4a   : > { %291 = vrot.lane.b32.xlu1 %v1111_v14, %s933_s26  ;;  %289 = vrot.lane.b32.xlu0 %v1114_v15, %s933_s26  ;;  %v352_v41 = vadd.f32 %v350_v37, %v346_v36 }
  0x4b   : > { %v355_v42 = vmul.f32 -10.0, %v353_v38 }
  0x4c   : > { %v354_v45 = vmul.f32 -10.0, %v352_v41 }
  0x4d   : > { %v358_v46 = vmul.f32 1.442695, %v355_v42 }
  0x4e   : > { %262 = vrot.lane.b32.xlu1 %v1087_v6, %s933_s26  ;;  %260 = vrot.lane.b32.xlu0 %v1116_v16, %s933_s26  ;;  %v356_v48 = vmul.f32 1.442695, %v354_v45 }
  0x4f   : > { %771 = vpow2.f32 %v358_v46 }
  0x50   : > { %773 = vpow2.f32 %v356_v48 }
  0x52   : > { %295 = vrot.lane.b32.xlu1 %v1137_v23, %s933_s26  ;;  %293 = vrot.lane.b32.xlu0 %v1142_v27, %s933_s26 }
  0x56   : > { %250 = vrot.lane.b32.xlu1 %v1092_v9, %s933_s26  ;;  %248 = vrot.lane.b32.xlu0 %v1145_v28, %s933_s26 }
  0x5a   : > { %283 = vrot.lane.b32.xlu1 %v1160_v39, %s933_s26  ;;  %281 = vrot.lane.b32.xlu0 %v1163_v40, %s933_s26 }
  0x5c   : > { %v772_v52 = vpop.eup %771 }
  0x5d   : > { %v774_v54 = vpop.eup %773  ;;  %v365_v55 = vmul.f32 %v772_v52, %v363_v51 }
  0x5e   : > { %v364_v56 = vmul.f32 %v774_v54, %v362_v53 }
  0x5f   : > { %v367_v57 = vsel %vm245_vm1, %v365_v55, 0.0 }
  0x60   : > { %v368_v58 = vadd.f32 %v367_v57, %v364_v56 }
  0x7e   : > { %369 = vadd.xlane.f32.xlu1 %v368_v58 }
  0xb0   : > { %v257_v59 = vpop.permute.xlu1 %256  ;;  %v253_v60 = vpop.permute.xlu0 %252 }
  0xb1   : > { %v301_v63 = vsub.f32 %v1075_v2, %v257_v59  ;;  %v297_v7 = vsub.f32 %v1077_v3, %v253_v60  ;;  %v411_v19 = vsub.f32 %v1114_v15, %v257_v59  ;;  %v407_v20 = vsub.f32 %v1102_v11, %v253_v60 }
  0xb3   : > { %v303_v18 = vand.u32 2147483647, %v301_v63  ;;  %v299_v24 = vand.u32 2147483647, %v297_v7  ;;  %v413_v33 = vand.u32 2147483647, %v411_v19 }
  0xb4   : > { %v259_v61 = vpop.permute.xlu1 %258  ;;  %v255_v62 = vpop.permute.xlu0 %254 }
  0xb5   : > { %v302_v8 = vsub.f32 %v1079_v4, %v259_v61  ;;  %v298_v12 = vsub.f32 %v1085_v5, %v255_v62  ;;  %v412_v13 = vsub.f32 %v1111_v14, %v259_v61  ;;  %v408_v17 = vsub.f32 %v1099_v10, %v255_v62 }
  0xb6   : > { %v409_v10 = vand.u32 2147483647, %v407_v20  ;;  %v305_v11 = vadd.f32 %v303_v18, %v299_v24 }
  0xb7   : > { %v304_v25 = vand.u32 2147483647, %v302_v8  ;;  %v300_v26 = vand.u32 2147483647, %v298_v12  ;;  %v414_v31 = vand.u32 2147483647, %v412_v13 }
  0xb8   : > { %v288_v0 = vpop.permute.xlu1 %287  ;;  %v286_v1 = vpop.permute.xlu0 %285  ;;  %v410_v32 = vand.u32 2147483647, %v408_v17  ;;  %v415_v48 = vadd.f32 %v413_v33, %v409_v10 }
  0xb9   : > { %v380_v14 = vsub.f32 %v1085_v5, %v288_v0  ;;  %v379_v34 = vsub.f32 %v1077_v3, %v286_v1  ;;  %v306_v36 = vadd.f32 %v304_v25, %v300_v26 }
  0xba   : > { %v416_v43 = vadd.f32 %v414_v31, %v410_v32 }
  0xbb   : > { %v382_v5 = vand.u32 2147483647, %v380_v14  ;;  %v381_v3 = vand.u32 2147483647, %v379_v34 }
  0xbc   : > { %v292_v21 = vpop.permute.xlu1 %291  ;;  %v290_v22 = vpop.permute.xlu0 %289 }
  0xbd   : > { %v384_v29 = vsub.f32 %v1079_v4, %v292_v21  ;;  %v383_v30 = vsub.f32 %v1075_v2, %v290_v22 }
  0xbf   : > { %v386_v41 = vand.u32 2147483647, %v384_v29  ;;  %v385_v4 = vand.u32 2147483647, %v383_v30 }
  0xc0   : > { %v263_v15 = vpop.permute.xlu1 %262  ;;  %v261_v35 = vpop.permute.xlu0 %260 }
  0xc1   : > { %v308_v37 = vsub.f32 %v1087_v6, %v263_v15  ;;  %v418_v38 = vsub.f32 %v1137_v23, %v263_v15  ;;  %v307_v2 = vsub.f32 %v1116_v16, %v261_v35  ;;  %v417_v42 = vsub.f32 %v1142_v27, %v261_v35 }
  0xc2   : > { %v388_v56 = vadd.f32 %v386_v41, %v382_v5  ;;  %v387_v57 = vadd.f32 %v385_v4, %v381_v3 }
  0xc3   : > { %v310_v45 = vand.u32 2147483647, %v308_v37  ;;  %v420_v46 = vand.u32 2147483647, %v418_v38  ;;  %v309_v49 = vand.u32 2147483647, %v307_v2 }
  0xc4   : > { %v419_v50 = vand.u32 2147483647, %v417_v42  ;;  %v296_v51 = vpop.permute.xlu1 %295  ;;  %v294_v52 = vpop.permute.xlu0 %293 }
  0xc5   : > { %v312_v53 = vadd.f32 %v310_v45, %v306_v36  ;;  %v422_v54 = vadd.f32 %v420_v46, %v416_v43  ;;  %v390_v23 = vsub.f32 %v1087_v6, %v296_v51  ;;  %v389_v55 = vsub.f32 %v1116_v16, %v294_v52 }
  0xc6   : > { %v311_v58 = vadd.f32 %v309_v49, %v305_v11  ;;  %v421_v27 = vadd.f32 %v419_v50, %v415_v48  ;;  %v934_v51 = vmov 0.0  }
  0xc7   : > { %v314_v59 = vmul.f32 -10.0, %v312_v53  ;;  %v424_v60 = vmul.f32 -10.0, %v422_v54  ;;  %v392_v61 = vand.u32 2147483647, %v390_v23  ;;  %v391_v62 = vand.u32 2147483647, %v389_v55 }
  0xc8   : > { %v313_v63 = vmul.f32 -10.0, %v311_v58  ;;  %v423_v0 = vmul.f32 -10.0, %v421_v27  ;;  %v251_v16 = vpop.permute.xlu1 %250  ;;  %v249_v21 = vpop.permute.xlu0 %248  ;;  %227 = vst [vmem:[%s1215_s21] sm:$0x1] %v934_v51 }
  0xc9   : > { %v317_v1 = vmul.f32 1.442695, %v314_v59  ;;  %v427_v7 = vmul.f32 1.442695, %v424_v60  ;;  %v394_v8 = vadd.f32 %v392_v61, %v388_v56  ;;  %v393_v12 = vadd.f32 %v391_v62, %v387_v57 }
  0xca   : > { %v315_v13 = vmul.f32 1.442695, %v313_v63  ;;  %v425_v17 = vmul.f32 1.442695, %v423_v0  ;;  %v320_v22 = vsub.f32 %v1092_v9, %v251_v16  ;;  %v319_v25 = vsub.f32 %v1145_v28, %v249_v21 }
  0xcb   : > { %775 = vpow2.f32 %v317_v1  ;;  %v396_v6 = vmul.f32 -10.0, %v394_v8  ;;  %v395_v18 = vmul.f32 -10.0, %v393_v12  ;;  %v430_v30 = vsub.f32 %v1160_v39, %v251_v16 }
  0xcc   : > { %777 = vpow2.f32 %v427_v7  ;;  %v284_v24 = vpop.permute.xlu1 %283  ;;  %v282_v26 = vpop.permute.xlu0 %281  ;;  %v322_v29 = vand.u32 2147483647, %v320_v22  ;;  %v429_v32 = vsub.f32 %v1163_v40, %v249_v21  ;;  %v321_v33 = vand.u32 2147483647, %v319_v25 }
  0xcd   : > { %779 = vpow2.f32 %v315_v13  ;;  %v399_v19 = vmul.f32 1.442695, %v396_v6  ;;  %v397_v20 = vmul.f32 1.442695, %v395_v18  ;;  %v402_v31 = vsub.f32 %v1092_v9, %v284_v24 }
  0xce   : > { %781 = vpow2.f32 %v425_v17  ;;  %v401_v14 = vsub.f32 %v1145_v28, %v282_v26  ;;  %v432_v35 = vand.u32 2147483647, %v430_v30  ;;  %v431_v37 = vand.u32 2147483647, %v429_v32 }
  0xcf   : > { %783 = vpow2.f32 %v399_v19  ;;  %v404_v11 = vand.u32 2147483647, %v402_v31  ;;  %v450_v22 = vld [vmem:[%s1215_s21] sm:$0x1] }
  0xd0   : > { %785 = vpow2.f32 %v397_v20  ;;  %v403_v38 = vand.u32 2147483647, %v401_v14 }
  0xd8   : > { %v776_v10 = vpop.eup %775 }
  0xd9   : > { %v778_v34 = vpop.eup %777  ;;  %v324_v15 = vmul.f32 %v776_v10, %v322_v29 }
  0xda   : > { %v780_v36 = vpop.eup %779  ;;  %v434_v40 = vmul.f32 %v778_v34, %v432_v35 }
  0xdb   : > { %v782_v41 = vpop.eup %781  ;;  %v323_v4 = vmul.f32 %v780_v36, %v321_v33  ;;  %v326_v39 = vsel %vm240_vm2, %v324_v15, 0.0 }
  0xdc   : > { %v784_v9 = vpop.eup %783  ;;  %v433_v43 = vmul.f32 %v782_v41, %v431_v37 }
  0xdd   : > { %v786_v2 = vpop.eup %785  ;;  %v406_v42 = vmul.f32 %v784_v9, %v404_v11  ;;  %v325_v28 = vsel %vm240_vm2, %v323_v4, 0.0 }
  0xde   : > { %v405_v5 = vmul.f32 %v786_v2, %v403_v38  ;;  %v327_v45 = vadd.f32 %v326_v39, %v325_v28 }
  0xdf   : > { %v436_v46 = vadd.f32 %v434_v40, %v406_v42 }
  0xe0   : > { %328 = vadd.xlane.f32.xlu0 %v327_v45  ;;  %v435_v48 = vadd.f32 %v433_v43, %v405_v5 }
  0xe1   : > { %v438_v3 = vsel %vm1174_vm3, %v436_v46, 0.0 }
  0xe2   : > { %v437_v49 = vsel %vm240_vm2, %v435_v48, 0.0 }
  0xe3   : > { %v439_v50 = vadd.f32 %v438_v3, %v437_v49 }
  0xe5   : > { %440 = vadd.xlane.f32.xlu0 %v439_v50 }
 0x107   : > { %v370_v52 = vpop.xlane.xlu1 %369 }
 0x108   : > { %v371_v53 = vrot.slane %v370_v52, 4 }
 0x10a   : > { %v372_v54 = vadd.f32 %v371_v53, %v370_v52 }
 0x10c   : > { %v373_v23 = vrot.slane %v372_v54, 2 }
 0x10e   : > { %v374_v58 = vadd.f32 %v373_v23, %v372_v54 }
 0x110   : > { %v375_v61 = vrot.slane %v374_v58, 1 }
 0x112   : > { %v376_v7 = vadd.f32 %v375_v61, %v374_v58 }
 0x169   : > { %v329_v55 = vpop.xlane.xlu0 %328 }
 0x16a   : > { %v330_v56 = vrot.slane %v329_v55, 4 }
 0x16c   : > { %v331_v57 = vadd.f32 %v330_v56, %v329_v55 }
 0x16e   : > { %v332_v47 = vrot.slane %v331_v57, 2  ;;  %v441_v27 = vpop.xlane.xlu0 %440 }
 0x16f   : > { %v442_v59 = vrot.slane %v441_v27, 4 }
 0x170   : > { %v333_v44 = vadd.f32 %v332_v47, %v331_v57 }
 0x171   : > { %v443_v60 = vadd.f32 %v442_v59, %v441_v27 }
 0x172   : > { %v334_v62 = vrot.slane %v333_v44, 1 }
 0x173   : > { %v444_v63 = vrot.slane %v443_v60, 2 }
 0x174   : > { %v335_v0 = vadd.f32 %v334_v62, %v333_v44 }
 0x175   : > { %v445_v1 = vadd.f32 %v444_v63, %v443_v60 }
 0x176   : > { %694 = vpush %v335_v0 }
 0x177   : > { %696 = vpush %v376_v7  ;;  %v446_v8 = vrot.slane %v445_v1, 1 }
 0x179   : > { %v447_v12 = vadd.f32 %v446_v8, %v445_v1 }
 0x17b   : > { %698 = vpush %v447_v12 }
 0x1a7   : > { %s695_s29 = spop %694 }
 0x1a8   : > { %v337_v13 = vstv %s695_s29  ;;  %s697_s3 = spop %696 }
 0x1a9   : > { %v378_v17 = vstv %s697_s3  ;;  %v451_v6 = vmul.f32 0.000246063, %v337_v13 }
 0x1aa   : > { %v452_v18 = vmul.f32 0.00026041668, %v378_v17 }
 0x1ac   : > { %s699_s7 = spop %698  ;;  %v453_v19 = vadd.f32 %v452_v18, %v451_v6 }
 0x1ad   : > { %v449_v16 = vstv %s699_s7 }
 0x1ae   : > { %v454_v20 = vmul.f32 0.0002624672, %v449_v16 }
 0x1b0   : > { %v455_v21 = vadd.f32 %v454_v20, %v453_v19 }
 0x1b2   : > { %v456_v24 = vmul.f32 0.25, %v455_v21 }
 0x1b4   : > { %v457_v25 = vadd.f32 %v456_v24, %v450_v22 }
 0x1b6   : > { %458 = vst [vmem:[%s1215_s21] sm:$0x1] %v457_v25 }
 0x1b7   : > { %856 = shalt.err (!%p853_p7)
}
 0x1b8   : > { %s857_s12 = scalar_lea.hbm %s568_s4, 16  ;;  %s861_s19 = scalar_lea.hbm %s1263_s2, 32 }
 0x1b9   : > { %p858_p1 = scmp.ne.s32.totalorder %s568_s4, %s857_s12  ;;  %p862_p3 = scmp.lt.s32.totalorder %s568_s4, %s1263_s2 }
 0x1ba   : > { %p863_p8 = scmp.lt.s32.totalorder %s861_s19, %s857_s12 }
 0x1bb   : > { %p859_p10 = pnand %p858_p1, %p1002_p9 }
 0x1bc   : > { %p864_p0 = por %p863_p8, %p862_p3 }
 0x1bd   : > { %p860_p13 = pneg %p859_p10 }
 0x1bf   : > { %p865_p12 = pnand %p864_p0, %p860_p13 }
 0x1c1   : > { %868 = shalt.err (!%p865_p12)
}
 0x1c2   : > { %704 = dma.vmem_to_hbm [thread:$0]  (%p1002_p9), %s571_s15, 16, %s568_s4, %s558_s6  }
 0x1c3 PF: > { %s582_s29 = sand.u32 1, %s907_s9   ;;  %p1272_p2 = scmp.ge.s32.totalorder %s927_s14, 2 }
 0x1c4   : > { %s583_s3 = scalar_lea.sflag [#allocation6], %s582_s29 }
 0x1c5   : > { %p714_p5 = pnand %p1272_p2, %p1009_p11 }
 0x1c7   : > { %p715_p6 = pneg %p714_p5 }
 0x1c9   : > { %902 = dma.done.wait (%p715_p6), %s583_s3, 16  }
 0x1ca   : > { %904 = vsyncadd (%p715_p6), %s583_s3, 4294967280  ;;  %s21_s14 = sadd.s32 1, %s927_s14   ;;  %s1273_s9 = smov %s911_s10 }
 0x1cb   : > { %p18_p4 = scmp.ge.s32.totalorder %s21_s14, 4   ;;  %s1274_s10 = smov %s915_s11 }
 0x1cc   : > { %s1275_s11 = smov %s1007_s23  ;;  %s1276_s12 = smov %s923_s13 }
 0x1cd   : > { %s1277_s13 = smov %s1279_s17  ;;  %20 = sbr.rel (!%p18_p4) target bundleno = 8 (0x8), region = 100 }
 0x1d2   :  { %587 = vsyncpa [#allocation5], 1 }
 0x1d3   :  { %589 = vsyncpa [#allocation5 + $0x1], 1 }
 0x1d4   :  { %590 = vsyncpa [#allocation8], 1 }
 0x1d5   :  { %592 = vsyncpa [#allocation8 + $0x1], 1 }
 0x1d6   :  { %593 = vsyncpa [#allocation6], 1 }
 0x1d7   :  { %595 = vsyncpa [#allocation6 + $0x1], 1 }

</bundles_post_ra>
